<compile_context>
chip_gen: v6e
topology: v6e:2x2x1
jax: 0.10.0
libtpu: 0.0.40
codegen_flags: <defaults>
</compile_context>

<pallas_src>
import jax
import jax.numpy as jnp
from jax.experimental import pallas as pl
from jax.experimental.pallas import tpu as pltpu


def _round_up(x, m):
    return ((x + m - 1) // m) * m


# ---------------------------------------------------------------------------
# Kernels
# ---------------------------------------------------------------------------

def _affine_fwd_kernel(x_ref, mask_ref, m_ref, logs_ref, y_ref, logdet_ref):
    """One (batch, T-tile) block.

    x_ref:      (1, C,  tt)  input tile
    mask_ref:   (1, mc, tt)  mask tile, mc in {1, C}
    m_ref:      (C, 1)       shift parameter
    logs_ref:   (C, 1)       log-scale parameter
    y_ref:      (1, C,  tt)  output tile
    logdet_ref: (1, 8, 128)  per-batch logdet accumulator (scalar replicated)
    """
    t = pl.program_id(1)

    x = x_ref[0].astype(jnp.float32)            # (C, tt)
    mask = mask_ref[0].astype(jnp.float32)      # (mc, tt)
    m = m_ref[...].astype(jnp.float32)          # (C, 1)
    logs = logs_ref[...].astype(jnp.float32)    # (C, 1)

    scale = jnp.exp(logs)                       # EUP slot, (C, 1)
    y = (m + scale * x) * mask                  # VPU, broadcast over lanes
    y_ref[0] = y.astype(y_ref.dtype)

    @pl.when(t == 0)
    def _():
        logdet_ref[...] = jnp.zeros_like(logdet_ref)

    # partial logdet for this tile: sum_{c, t_tile} logs_c * mask  (XLU reduce)
    partial = jnp.sum(logs * mask)
    logdet_ref[...] += partial                  # scalar broadcast into the tile


def _affine_rev_kernel(y_ref, mask_ref, m_ref, logs_ref, x_ref):
    y = y_ref[0].astype(jnp.float32)
    mask = mask_ref[0].astype(jnp.float32)
    m = m_ref[...].astype(jnp.float32)
    logs = logs_ref[...].astype(jnp.float32)
    x = (y - m) * jnp.exp(-logs) * mask
    x_ref[0] = x.astype(x_ref.dtype)


# ---------------------------------------------------------------------------
# Wrappers
# ---------------------------------------------------------------------------

def _pad_time(x, x_mask, max_tile):
    """Pick a lane-dense T tile and zero-pad T up to a multiple of it."""
    B, C, T = x.shape
    tt = min(max_tile, _round_up(T, 128))
    T_pad = _round_up(T, tt)
    if T_pad != T:
        pad = ((0, 0), (0, 0), (0, T_pad - T))
        x = jnp.pad(x, pad)
        x_mask = jnp.pad(x_mask, pad)   # zero mask -> padded cols contribute 0
    return x, x_mask, tt, T_pad


def elementwise_affine_forward(x, x_mask, m, logs, *, max_tile_t=512):
    """ElementwiseAffine.forward(x, x_mask, reverse=False).

    x: (B, C, T), x_mask: (B, 1, T) or (B, C, T), m/logs: (C, 1).
    Returns (y (B, C, T), logdet (B,) float32).
    """
    B, C, T = x.shape
    x_p, mask_p, tt, T_pad = _pad_time(x, x_mask, max_tile_t)
    mc = mask_p.shape[1]
    nt = T_pad // tt

    itemsize = jnp.dtype(x.dtype).itemsize
    cost = pl.CostEstimate(
        flops=5 * B * C * T_pad,
        transcendentals=B * nt * C,
        bytes_accessed=(B * C * T_pad * 2 + B * mc * T_pad) * itemsize
        + 2 * C * 4 + B * 8 * 128 * 4,
    )

    y_p, logdet_tile = pl.pallas_call(
        _affine_fwd_kernel,
        out_shape=(
            jax.ShapeDtypeStruct((B, C, T_pad), x.dtype),
            jax.ShapeDtypeStruct((B, 8, 128), jnp.float32),
        ),
        grid_spec=pltpu.PrefetchScalarGridSpec(
            num_scalar_prefetch=0,
            grid=(B, nt),
            in_specs=[
                pl.BlockSpec((1, C, tt), lambda b, t: (b, 0, t)),   # x tile
                pl.BlockSpec((1, mc, tt), lambda b, t: (b, 0, t)),  # mask tile
                pl.BlockSpec((C, 1), lambda b, t: (0, 0)),          # m (const)
                pl.BlockSpec((C, 1), lambda b, t: (0, 0)),          # logs (const)
            ],
            out_specs=[
                pl.BlockSpec((1, C, tt), lambda b, t: (b, 0, t)),   # y tile
                pl.BlockSpec((1, 8, 128), lambda b, t: (b, 0, 0)),  # logdet acc
            ],
        ),
        compiler_params=pltpu.CompilerParams(
            dimension_semantics=("parallel", "arbitrary")),
        cost_estimate=cost,
    )(x_p, mask_p, m, logs)

    y = y_p[:, :, :T] if T_pad != T else y_p
    logdet = logdet_tile[:, 0, 0]
    return y, logdet


def elementwise_affine_reverse(y, x_mask, m, logs, *, max_tile_t=512):
    """ElementwiseAffine.forward(x, x_mask, reverse=True)."""
    B, C, T = y.shape
    y_p, mask_p, tt, T_pad = _pad_time(y, x_mask, max_tile_t)
    mc = mask_p.shape[1]
    nt = T_pad // tt

    x_p = pl.pallas_call(
        _affine_rev_kernel,
        out_shape=jax.ShapeDtypeStruct((B, C, T_pad), y.dtype),
        grid_spec=pltpu.PrefetchScalarGridSpec(
            num_scalar_prefetch=0,
            grid=(B, nt),
            in_specs=[
                pl.BlockSpec((1, C, tt), lambda b, t: (b, 0, t)),
                pl.BlockSpec((1, mc, tt), lambda b, t: (b, 0, t)),
                pl.BlockSpec((C, 1), lambda b, t: (0, 0)),
                pl.BlockSpec((C, 1), lambda b, t: (0, 0)),
            ],
            out_specs=pl.BlockSpec((1, C, tt), lambda b, t: (b, 0, t)),
        ),
        compiler_params=pltpu.CompilerParams(
            dimension_semantics=("parallel", "parallel")),
    )(y_p, mask_p, m, logs)

    return x_p[:, :, :T] if T_pad != T else x_p


# ---------------------------------------------------------------------------
# Self-test
# ---------------------------------------------------------------------------

if __name__ == "__main__":
    # Small shapes consistent with the module: batch=2, channels=4, T=16.
    B, C, T = 2, 4, 16

    key = jax.random.PRNGKey(0)
    kx, km, kl = jax.random.split(key, 3)
    x = jax.random.normal(kx, (B, C, T), dtype=jnp.float32)
    # nn.Parameter inits to zeros in the module; use nonzero values to actually
    # exercise the affine math.
    m = 0.1 * jax.random.normal(km, (C, 1), dtype=jnp.float32)
    logs = 0.1 * jax.random.normal(kl, (C, 1), dtype=jnp.float32)

    # sequence mask (B, 1, T): lengths [16, 10]
    lengths = jnp.array([16, 10], dtype=jnp.int32)
    t_iota = jnp.arange(T, dtype=jnp.int32)[None, None, :]
    x_mask = (t_iota < lengths[:, None, None]).astype(jnp.float32)

    fwd = jax.jit(elementwise_affine_forward)
    rev = jax.jit(elementwise_affine_reverse)

    y, logdet = fwd(x, x_mask, m, logs)
    x_rec = rev(y, x_mask, m, logs)
    jax.block_until_ready((y, logdet, x_rec))

    # pure-JAX reference
    ref_y = (m + jnp.exp(logs) * x) * x_mask
    ref_logdet = jnp.sum(logs * x_mask, axis=(1, 2))
    ref_x_rec = (y - m) * jnp.exp(-logs) * x_mask

    assert y.shape == (B, C, T) and logdet.shape == (B,)
    assert jnp.allclose(y, ref_y, atol=1e-5)
    assert jnp.allclose(logdet, ref_logdet, atol=1e-5)
    assert jnp.allclose(x_rec, ref_x_rec, atol=1e-5)
    assert jnp.allclose(x_rec, x * x_mask, atol=1e-5)  # round-trip inside mask

    print("KERNEL_OK")
</pallas_src>

<mosaic_0001>
module attributes {stable_mosaic.version = 11 : i64} {
  func.func @_affine_fwd_kernel(%arg0: i32, %arg1: i32, %arg2: memref<1x4x128xf32, #tpu.memory_space<vmem>>, %arg3: memref<1x1x128xf32, #tpu.memory_space<vmem>>, %arg4: memref<4x1xf32, #tpu.memory_space<vmem>>, %arg5: memref<4x1xf32, #tpu.memory_space<vmem>>, %arg6: memref<1x4x128xf32, #tpu.memory_space<vmem>>, %arg7: memref<1x8x128xf32, #tpu.memory_space<vmem>>) attributes {dimension_semantics = [#tpu.dimension_semantics<parallel>, #tpu.dimension_semantics<arbitrary>], iteration_bounds = array<i64: 2, 1>, scalar_prefetch = 0 : i64, scratch_operands = 0 : i64, tpu.core_type = #tpu.core_type<tc>, window_params = [{transform_indices = @transform_0, window_bounds = array<i64: 1, 4, 128>}, {transform_indices = @transform_1, window_bounds = array<i64: 1, 1, 128>}, {pipeline_mode = #tpu.pipeline_mode<synchronous>, transform_indices = @transform_2, window_bounds = array<i64: 4, 1>}, {pipeline_mode = #tpu.pipeline_mode<synchronous>, transform_indices = @transform_3, window_bounds = array<i64: 4, 1>}, {transform_indices = @transform_4, window_bounds = array<i64: 1, 4, 128>}, {transform_indices = @transform_5, window_bounds = array<i64: 1, 8, 128>}]} {
    %c0 = arith.constant 0 : index
    %c0_0 = arith.constant 0 : index
    %c0_1 = arith.constant 0 : index
    %0 = vector.load %arg2[%c0, %c0_0, %c0_1] : memref<1x4x128xf32, #tpu.memory_space<vmem>>, vector<1x4x128xf32>
    %1 = vector.shape_cast %0 : vector<1x4x128xf32> to vector<4x128xf32>
    %c0_2 = arith.constant 0 : index
    %c0_3 = arith.constant 0 : index
    %c0_4 = arith.constant 0 : index
    %2 = vector.load %arg3[%c0_2, %c0_3, %c0_4] : memref<1x1x128xf32, #tpu.memory_space<vmem>>, vector<1x1x128xf32>
    %3 = vector.shape_cast %2 : vector<1x1x128xf32> to vector<1x128xf32>
    %c0_5 = arith.constant 0 : index
    %c0_6 = arith.constant 0 : index
    %4 = vector.load %arg4[%c0_5, %c0_6] : memref<4x1xf32, #tpu.memory_space<vmem>>, vector<4x1xf32>
    %c0_7 = arith.constant 0 : index
    %c0_8 = arith.constant 0 : index
    %5 = vector.load %arg5[%c0_7, %c0_8] : memref<4x1xf32, #tpu.memory_space<vmem>>, vector<4x1xf32>
    %6 = math.exp %5 : vector<4x1xf32>
    %7 = vector.broadcast %6 : vector<4x1xf32> to vector<4x128xf32>
    %8 = arith.mulf %7, %1 : vector<4x128xf32>
    %9 = vector.broadcast %4 : vector<4x1xf32> to vector<4x128xf32>
    %10 = arith.addf %9, %8 : vector<4x128xf32>
    %11 = vector.broadcast %3 : vector<1x128xf32> to vector<4x128xf32>
    %12 = arith.mulf %10, %11 : vector<4x128xf32>
    %c0_9 = arith.constant 0 : index
    %c0_10 = arith.constant 0 : index
    %c0_11 = arith.constant 0 : index
    %13 = vector.load %arg6[%c0_9, %c0_10, %c0_11] : memref<1x4x128xf32, #tpu.memory_space<vmem>>, vector<1x4x128xf32>
    %14 = vector.shape_cast %13 : vector<1x4x128xf32> to vector<4x128xf32>
    %15 = vector.shape_cast %12 : vector<4x128xf32> to vector<1x4x128xf32>
    tpu.vector_store %arg6[%c0_9, %c0_10, %c0_11], %15 {strides = array<i32>} : memref<1x4x128xf32, #tpu.memory_space<vmem>>, vector<1x4x128xf32>,
    %c0_i32 = arith.constant 0 : i32
    %16 = arith.cmpi eq, %arg1, %c0_i32 : i32
    %17 = arith.extui %16 : i1 to i32
    %c0_i32_12 = arith.constant 0 : i32
    %18 = arith.cmpi ne, %17, %c0_i32_12 : i32
    scf.if %18 {
      %cst_19 = arith.constant 0.000000e+00 : f32
      %30 = vector.broadcast %cst_19 : f32 to vector<1x8x128xf32>
      %c0_20 = arith.constant 0 : index
      %c0_21 = arith.constant 0 : index
      %c0_22 = arith.constant 0 : index
      %31 = vector.load %arg7[%c0_20, %c0_21, %c0_22] : memref<1x8x128xf32, #tpu.memory_space<vmem>>, vector<1x8x128xf32>
      tpu.vector_store %arg7[%c0_20, %c0_21, %c0_22], %30 {strides = array<i32>} : memref<1x8x128xf32, #tpu.memory_space<vmem>>, vector<1x8x128xf32>,
    } else {
    }
    %19 = vector.broadcast %5 : vector<4x1xf32> to vector<4x128xf32>
    %20 = vector.broadcast %3 : vector<1x128xf32> to vector<4x128xf32>
    %21 = arith.mulf %19, %20 : vector<4x128xf32>
    %22 = vector.shape_cast %21 : vector<4x128xf32> to vector<1x4x128xf32>
    %cst = arith.constant dense<0.000000e+00> : vector<1xf32>
    %23 = vector.multi_reduction <add>, %22, %cst [1, 2] : vector<1x4x128xf32> to vector<1xf32>
    %24 = vector.shape_cast %23 : vector<1xf32> to vector<1x1x1xf32>
    %25 = vector.extract %24[0, 0, 0] : f32 from vector<1x1x1xf32>
    %c0_13 = arith.constant 0 : index
    %c0_14 = arith.constant 0 : index
    %c0_15 = arith.constant 0 : index
    %26 = vector.load %arg7[%c0_13, %c0_14, %c0_15] : memref<1x8x128xf32, #tpu.memory_space<vmem>>, vector<1x8x128xf32>
    %27 = vector.broadcast %25 : f32 to vector<1x8x128xf32>
    %28 = arith.addf %26, %27 : vector<1x8x128xf32>
    %c0_16 = arith.constant 0 : index
    %c0_17 = arith.constant 0 : index
    %c0_18 = arith.constant 0 : index
    %29 = vector.load %arg7[%c0_16, %c0_17, %c0_18] : memref<1x8x128xf32, #tpu.memory_space<vmem>>, vector<1x8x128xf32>
    tpu.vector_store %arg7[%c0_16, %c0_17, %c0_18], %28 {strides = array<i32>} : memref<1x8x128xf32, #tpu.memory_space<vmem>>, vector<1x8x128xf32>,
    return
  }
  func.func @transform_0(%arg0: i32, %arg1: i32) -> (i32, i32, i32) {
    %c0_i32 = arith.constant 0 : i32
    %c0_i32_0 = arith.constant 0 : i32
    return %arg0, %c0_i32, %arg1 : i32, i32, i32
  }
  func.func @transform_1(%arg0: i32, %arg1: i32) -> (i32, i32, i32) {
    %c0_i32 = arith.constant 0 : i32
    %c0_i32_0 = arith.constant 0 : i32
    return %arg0, %c0_i32, %arg1 : i32, i32, i32
  }
  func.func @transform_2(%arg0: i32, %arg1: i32) -> (i32, i32) {
    %c0_i32 = arith.constant 0 : i32
    %c0_i32_0 = arith.constant 0 : i32
    %c0_i32_1 = arith.constant 0 : i32
    return %c0_i32, %c0_i32_0 : i32, i32
  }
  func.func @transform_3(%arg0: i32, %arg1: i32) -> (i32, i32) {
    %c0_i32 = arith.constant 0 : i32
    %c0_i32_0 = arith.constant 0 : i32
    %c0_i32_1 = arith.constant 0 : i32
    return %c0_i32, %c0_i32_0 : i32, i32
  }
  func.func @transform_4(%arg0: i32, %arg1: i32) -> (i32, i32, i32) {
    %c0_i32 = arith.constant 0 : i32
    %c0_i32_0 = arith.constant 0 : i32
    return %arg0, %c0_i32, %arg1 : i32, i32, i32
  }
  func.func @transform_5(%arg0: i32, %arg1: i32) -> (i32, i32, i32) {
    %c0_i32 = arith.constant 0 : i32
    %c0_i32_0 = arith.constant 0 : i32
    %c0_i32_1 = arith.constant 0 : i32
    return %arg0, %c0_i32, %c0_i32_0 : i32, i32, i32
  }
}

</mosaic_0001>

<bundles_post_ra>
// kernel: elementwise_affine_forward.1
= control target key start
LH: loop header
LB: loop body
LE: loop exit
PB: predicated region body
PF: predicated region fallthrough
CT: control target
= control target key end

     0   :  { %11 = vsyncpa [#allocation3], 0  ;;  %s764_s0 = inlined_call_operand.vmem [shape: f32[2,4,128], index: 0, kind: input, shape index: {}]   ;;  %s765_s1 = inlined_call_operand.vmem [shape: f32[2,1,128], index: 1, kind: input, shape index: {}]   ;;  %s766_s2 = inlined_call_operand.vmem [shape: f32[4,1], index: 2, kind: input, shape index: {}]   ;;  %s767_s3 = inlined_call_operand.vmem [shape: f32[4,1], index: 3, kind: input, shape index: {}]   ;;  %s768_s4 = inlined_call_operand.hbm [shape: f32[2,4,128], index: 4, kind: output, shape index: {0}]   ;;  %s769_s5 = inlined_call_operand.vmem [shape: f32[2,8,128], index: 5, kind: output, shape index: {1}]  }
   0x1   :  { %13 = vsyncpa [#allocation3 + $0x1], 0  ;;  %s648_s18 = smov 0   ;;  %s650_s19 = smov 0  }
   0x2   :  { %s652_s20 = smov 0   ;;  %s654_s21 = smov 0  }
   0x3   :  { %s656_s22 = smov 0   ;;  %s658_s23 = smov 0  }
   0x4 LB: > { %s462_s24 = sadd.s32 4294967295, %s614_s23   ;;  %s463_s25 = sadd.s32 4294967294, %s614_s23   ;;  %s614_s23 = sphi %s658_s23, %s19_s23   ;;  %s610_s22 = sphi %s656_s22, %s776_s22   ;;  %s606_s21 = sphi %s654_s21, %s775_s21   ;;  %s602_s20 = sphi %s652_s20, %s774_s20   ;;  %s598_s19 = sphi %s650_s19, %s773_s19   ;;  %s594_s18 = sphi %s648_s18, %s772_s18  }
   0x5   : > { %s31_s26 = sadd.s32 1, %s610_s22  ;;  %s138_s27 = sadd.s32 1, %s602_s20 }
   0x6   : > { %p33_p0 = scmp.ge.s32.totalorder %s31_s26, 2  ;;  %p148_p1 = scmp.ne.s32.totalorder %s602_s20, %s598_s19 }
   0x7   : > { %p149_p2 = scmp.eq.s32.totalorder %s462_s24, 1  ;;  %p154_p3 = scmp.ne.s32.totalorder %s598_s19, %s594_s18 }
   0x8   : > { %s778_s26 = smov (%p33_p0, %s31_s26), 0  ;;  %p155_p5 = scmp.eq.s32.totalorder %s463_s25, 1 }
   0x9   : > { %p688_p4 = por %p149_p2, %p148_p1  ;;  %s133_s29 = ssub.s32 %s610_s22, %s778_s26 }
   0xa   : > { %p466_p6 = scmp.ge.s32.totalorder %s614_s23, 1  ;;  %p136_p7 = scmp.eq.s32.totalorder %s133_s29, 0 }
   0xb   : > { %p695_p8 = por %p155_p5, %p154_p3  ;;  %p224_p9 = scmp.lt.s32.totalorder %s614_s23, 3 }
   0xc   : > { %s701_s6 = scalar_select %p136_p7, %s602_s20, %s138_s27  }
   0xd   : > { %p225_p10 = pnand %p466_p6, %p224_p9 }
   0xe   : > { %p264_p11 = scmp.lt.s32.totalorder (!%p225_p10), %s606_s21, 1  ;;  %s255_s25 = sand.u32 (!%p225_p10), 1, %s598_s19  }
   0xf   : > { %228 = sbr.rel (%p225_p10) target bundleno = 351 (0x15f), region = 36  ;;  %s467_s27 = sshll.u32 (!%p225_p10), %s255_s25, 2 }
  0x10   : > { %s257_s29 = scalar_lea.vmem (!%p225_p10), [#allocation2], %s467_s27  ;;  %s472_s7 = sshll.u32 (!%p225_p10), %s606_s21, 6 }
  0x11   : > { %s352_s8 = sshll.u32 (!%p225_p10), %s257_s29, 4  ;;  %s350_s12 = scalar_lea.hbm (!%p225_p10), %s768_s4, %s472_s7  ;;  %s353_s8 = int_to_ptr.vmem [resolvable:$true] %s352_s8 }
  0x12   : > { %s334_s13 = scalar_lea.sflag (!%p225_p10), [#allocation3], %s255_s25 }
  0x14   : > { %v284_v0 = vld [vmem:[%s767_s3] sm:$0xf]  ;;  %v616_v1 = vmov 0   ;;  %s711_s11 = scalar_select %p264_p11, %s606_s21, 1  ;;  %vm318_vm0 = vcmask 1043456  }
  0x15   : > { %534 = vset.pattern.permute.xlu0 %v616_v1  ;;  %v285_v2 = vmul.f32 1.442695, %v284_v0  ;;  %535 = vset.pattern.permute.xlu1 %v616_v1  ;;  %v283_v4 = vld [vmem:[%s766_s2] sm:$0xf] }
  0x16   : > { %314 = vperm.xlu0 %534, %v284_v0   ;;  %s276_s14 = scalar_lea.vmem %s765_s1, %s711_s11  ;;  %s468_s15 = sshll.u32 %s711_s11, 2 }
  0x17   : > { %536 = vpow2.f32 %v285_v2  ;;  %v470_v5 = vld [vmem:[%s276_s14] ss:$0 sm:$0xff]  ;;  %s270_s24 = scalar_lea.vmem %s764_s0, %s468_s15  ;;  %s538_s14 = scalar_lea.vmem %s353_s8, 64 }
  0x18   : > { %v281_v10 = vld [vmem:[%s270_s24] sm:$0xf]  ;;  %p539_p12 = scmp.ne.s32.totalorder %s353_s8, %s538_s14  ;;  %s617_s15 = smov [#allocation2]  }
  0x19   : > { %s542_s16 = sshll.u32 %s617_s15, 4  ;;  %s543_s16 = int_to_ptr.vmem [resolvable:$false] %s542_s16 }
  0x1a   : > { %p540_p13 = pnand %p539_p12, %p688_p4  ;;  %s544_s17 = scalar_lea.vmem %s543_s16, 128 }
  0x1b   : > { %p545_p1 = scmp.lt.s32.totalorder %s353_s8, %s543_s16  ;;  %p546_p2 = scmp.lt.s32.totalorder %s544_s17, %s538_s14 }
  0x1c   : > { %p541_p0 = pneg %p540_p13 }
  0x1d   : > { %p547_p3 = por %p546_p2, %p545_p1 }
  0x1f   : > { %p548_p5 = pnand %p547_p3, %p541_p0 }
  0x24   : > { %v537_v3 = vpop.eup %536 }
  0x25   : > { %289 = vperm.xlu1 %535, %v537_v3  }
  0x29   : > { %295 = vperm.xlu1 %535, %v283_v4  }
  0x91   : > { %v315_v6 = vpop.permute.xlu0 %314 }
  0x92   : > { %v317_v7 = vmul.f32 %v470_v5, %v315_v6 }
  0x94   : > { %v319_v8 = vsel %vm318_vm0, %v317_v7, 0.0 }
  0x95   : > { %320 = vadd.xlane.f32.xlu0 %v319_v8 }
  0xa0   : > { %v290_v9 = vpop.permute.xlu1 %289 }
  0xa1   : > { %v292_v11 = vmul.f32 %v290_v9, %v281_v10 }
  0xa4   : > { %v296_v12 = vpop.permute.xlu1 %295 }
  0xa5   : > { %v298_v13 = vadd.f32 %v296_v12, %v292_v11 }
  0xa7   : > { %v305_v14 = vmul.f32 %v470_v5, %v298_v13 }
  0xa9   : > { %306 = vst [vmem:[%s257_s29] sm:$0xf] %v305_v14 }
  0xaa   : > { %551 = shalt.err (!%p548_p5)
}
  0xab   : > { %s552_s21 = scalar_lea.hbm %s350_s12, 64  ;;  %s556_s27 = scalar_lea.hbm %s768_s4, 128 }
  0xac   : > { %p553_p6 = scmp.ne.s32.totalorder %s350_s12, %s552_s21  ;;  %p557_p10 = scmp.lt.s32.totalorder %s350_s12, %s768_s4 }
  0xad   : > { %p558_p11 = scmp.lt.s32.totalorder %s556_s27, %s552_s21 }
  0xae   : > { %p554_p7 = pnand %p553_p6, %p688_p4 }
  0xaf   : > { %p559_p12 = por %p558_p11, %p557_p10 }
  0xb0   : > { %p555_p9 = pneg %p554_p7 }
  0xb2   : > { %p560_p13 = pnand %p559_p12, %p555_p9 }
  0xb4   : > { %563 = shalt.err (!%p560_p13)
}
  0xb5   : > { %477 = dma.vmem_to_hbm [thread:$0]  (%p688_p4), %s353_s8, 64, %s350_s12, %s334_s13  }
  0xb6   : > { %s469_s9 = sshll.u32 %s711_s11, 3 }
  0xb7   : > { %s280_s16 = scalar_lea.vmem %s769_s5, %s469_s9 }
 0x11e   : > { %v321_v15 = vpop.xlane.xlu0 %320 }
 0x11f   : > { %v322_v16 = vrot.slane %v321_v15, 4 }
 0x121   : > { %v323_v17 = vadd.f32 %v322_v16, %v321_v15 }
 0x123   : > { %v324_v18 = vrot.slane %v323_v17, 2 }
 0x125   : > { %v325_v19 = vadd.f32 %v324_v18, %v323_v17 }
 0x127   : > { %v326_v20 = vrot.slane %v325_v19, 1 }
 0x129   : > { %v327_v21 = vadd.f32 %v326_v20, %v325_v19 }
 0x12b   : > { %475 = vpush %v327_v21 }
 0x15c   : > { %s476_s10 = spop %475 }
 0x15d   : > { %v330_v22 = vstv %s476_s10 }
 0x15e   : > { %332 = vst [vmem:[%s280_s16] sm:$0xff] %v330_v22 }
 0x15f PF: > { %p483_p4 = scmp.ge.s32.totalorder %s614_s23, 2  ;;  %s367_s28 = sand.u32 1, %s594_s18  }
 0x160   : > { %s368_s8 = scalar_lea.sflag [#allocation3], %s367_s28 }
 0x161   : > { %p480_p0 = pnand %p483_p4, %p695_p8 }
 0x163   : > { %p481_p1 = pneg %p480_p0 }
 0x165   : > { %589 = dma.done.wait (%p481_p1), %s368_s8, 64  }
 0x166   : > { %591 = vsyncadd (%p481_p1), %s368_s8, 4294967232  ;;  %s19_s23 = sadd.s32 1, %s614_s23   ;;  %s772_s18 = smov %s598_s19 }
 0x167   : > { %p16_p2 = scmp.ge.s32.totalorder %s19_s23, 4   ;;  %s773_s19 = smov %s602_s20 }
 0x168   : > { %s774_s20 = smov %s701_s6  ;;  %s775_s21 = smov %s610_s22 }
 0x169   : > { %s776_s22 = smov %s778_s26  ;;  %18 = sbr.rel (!%p16_p2) target bundleno = 4 (0x4), region = 90 }
 0x16e   :  { %380 = vsyncpa [#allocation3], 1 }
 0x16f   :  { %382 = vsyncpa [#allocation3 + $0x1], 1 }

</bundles_post_ra>
